<compile_context>
chip_gen: v7x
topology: tpu7x:2x2x1
jax: 0.10.0
libtpu: 0.0.40
codegen_flags: <defaults>
</compile_context>

<pallas_src>
import functools

import jax
import jax.numpy as jnp
from jax.experimental import pallas as pl
from jax.experimental.pallas import tpu as pltpu


def clark_loss_kernel(x_ref, t_ref, norms_ref, *, n_rows, tile_n):
    i = pl.program_id(0)
    x = x_ref[...].astype(jnp.float32)
    t = t_ref[...].astype(jnp.float32)

    # Elementwise Clark term; reciprocal goes to the EUP slot.
    diff = x - t
    r = diff * pl.reciprocal(x + t, approx=False)

    # L2 norm over the feature (lane) axis -> (TN, 1).
    sq = jnp.sum(r * r, axis=1, keepdims=True)
    norms = jnp.sqrt(sq)

    # Mask rows of a padded partial last tile (padding could be 0 -> 0/0 NaN).
    row = jax.lax.broadcasted_iota(jnp.int32, norms.shape, 0) + i * tile_n
    norms = jnp.where(row < n_rows, norms, 0.0)

    norms_ref[...] = norms.astype(norms_ref.dtype)


def _pick_row_tile(n, d, itemsize):
    """Row-tile so each input block is ~2 MiB (fits 2 inputs x 2 buffers in
    scoped VMEM on v5e/v6e/v7x) while amortizing per-grid-step overhead."""
    budget = 2 * 1024 * 1024
    tn = max(1, budget // max(1, d * itemsize))
    tn = min(tn, 1024)
    tn = max(8, (tn // 8) * 8)          # sublane granularity
    n_pad = ((n + 7) // 8) * 8
    return min(tn, n_pad)


def clark_loss(x, t, *, tile_n=None):
    assert x.shape == t.shape and x.ndim == 2
    n, d = x.shape
    if tile_n is None:
        tile_n = _pick_row_tile(n, d, jnp.dtype(x.dtype).itemsize)
    n_tiles = pl.cdiv(n, tile_n)

    row_norms = pl.pallas_call(
        functools.partial(clark_loss_kernel, n_rows=n, tile_n=tile_n),
        out_shape=jax.ShapeDtypeStruct((n, 1), jnp.float32),
        grid=(n_tiles,),
        in_specs=[
            pl.BlockSpec((tile_n, d), lambda i: (i, 0)),
            pl.BlockSpec((tile_n, d), lambda i: (i, 0)),
        ],
        out_specs=pl.BlockSpec((tile_n, 1), lambda i: (i, 0)),
        compiler_params=pltpu.CompilerParams(
            dimension_semantics=("parallel",)),
    )(x, t)

    # mean over the batch of per-row L2 norms (== torch.norm(., dim=1).mean())
    return jnp.sum(row_norms) / n


def clark_loss_ref(x, t):
    r = (x.astype(jnp.float32) - t.astype(jnp.float32)) / (
        x.astype(jnp.float32) + t.astype(jnp.float32))
    return jnp.mean(jnp.linalg.norm(r, axis=1))


if __name__ == "__main__":
    key = jax.random.PRNGKey(0)
    k1, k2, k3, k4 = jax.random.split(key, 4)

    # Clark loss is normally used on non-negative (e.g. histogram) inputs;
    # keep values strictly positive so (input + target) != 0.
    N, D = 8, 32
    x = jax.random.uniform(k1, (N, D), dtype=jnp.float32, minval=0.1, maxval=1.0)
    t = jax.random.uniform(k2, (N, D), dtype=jnp.float32, minval=0.1, maxval=1.0)

    out = clark_loss(x, t)
    jax.block_until_ready(out)
    ref = clark_loss_ref(x, t)
    assert jnp.allclose(out, ref, rtol=1e-5, atol=1e-6), (out, ref)

    # Exercise the multi-tile path with a partial (masked) last tile.
    N2, D2 = 200, 160
    x2 = jax.random.uniform(k3, (N2, D2), dtype=jnp.float32, minval=0.1, maxval=1.0)
    t2 = jax.random.uniform(k4, (N2, D2), dtype=jnp.float32, minval=0.1, maxval=1.0)
    out2 = clark_loss(x2, t2, tile_n=64)
    jax.block_until_ready(out2)
    ref2 = clark_loss_ref(x2, t2)
    assert jnp.allclose(out2, ref2, rtol=1e-5, atol=1e-6), (out2, ref2)

    print("KERNEL_OK")
</pallas_src>

<mosaic_0001>
module attributes {stable_mosaic.version = 11 : i64} {
  func.func @clark_loss_kernel(%arg0: i32, %arg1: memref<8x32xf32, #tpu.memory_space<vmem>>, %arg2: memref<8x32xf32, #tpu.memory_space<vmem>>, %arg3: memref<8x1xf32, #tpu.memory_space<vmem>>) attributes {dimension_semantics = [#tpu.dimension_semantics<parallel>], iteration_bounds = array<i64: 1>, scalar_prefetch = 0 : i64, scratch_operands = 0 : i64, tpu.core_type = #tpu.core_type<tc>, window_params = [{transform_indices = @transform_0, window_bounds = array<i64: 8, 32>}, {transform_indices = @transform_1, window_bounds = array<i64: 8, 32>}, {transform_indices = @transform_2, window_bounds = array<i64: 8, 1>}]} {
    %c0 = arith.constant 0 : index
    %c0_0 = arith.constant 0 : index
    %0 = vector.load %arg1[%c0, %c0_0] : memref<8x32xf32, #tpu.memory_space<vmem>>, vector<8x32xf32>
    %c0_1 = arith.constant 0 : index
    %c0_2 = arith.constant 0 : index
    %1 = vector.load %arg2[%c0_1, %c0_2] : memref<8x32xf32, #tpu.memory_space<vmem>>, vector<8x32xf32>
    %2 = arith.subf %0, %1 : vector<8x32xf32>
    %3 = arith.addf %0, %1 : vector<8x32xf32>
    %4 = tpu.reciprocal %3 : vector<8x32xf32> -> vector<8x32xf32>
    %5 = arith.mulf %2, %4 : vector<8x32xf32>
    %6 = arith.mulf %5, %5 : vector<8x32xf32>
    %cst = arith.constant dense<0.000000e+00> : vector<8xf32>
    %7 = vector.multi_reduction <add>, %6, %cst [1] : vector<8x32xf32> to vector<8xf32>
    %8 = vector.shape_cast %7 : vector<8xf32> to vector<8x1xf32>
    %9 = math.sqrt %8 : vector<8x1xf32>
    %10 = tpu.iota {dimensions = array<i32: 0>} : vector<8x1xi32>
    %c8_i32 = arith.constant 8 : i32
    %11 = arith.muli %arg0, %c8_i32 : i32
    %12 = vector.broadcast %11 : i32 to vector<8x1xi32>
    %13 = arith.addi %10, %12 : vector<8x1xi32>
    %c8_i32_3 = arith.constant 8 : i32
    %14 = vector.broadcast %c8_i32_3 : i32 to vector<8x1xi32>
    %15 = arith.cmpi slt, %13, %14 : vector<8x1xi32>
    %cst_4 = arith.constant 0.000000e+00 : f32
    %16 = vector.broadcast %cst_4 : f32 to vector<8x1xf32>
    %17 = arith.select %15, %9, %16 : vector<8x1xi1>, vector<8x1xf32>
    %c0_5 = arith.constant 0 : index
    %c0_6 = arith.constant 0 : index
    %18 = vector.load %arg3[%c0_5, %c0_6] : memref<8x1xf32, #tpu.memory_space<vmem>>, vector<8x1xf32>
    tpu.vector_store %arg3[%c0_5, %c0_6], %17 {strides = array<i32>} : memref<8x1xf32, #tpu.memory_space<vmem>>, vector<8x1xf32>,
    return
  }
  func.func @transform_0(%arg0: i32) -> (i32, i32) {
    %c0_i32 = arith.constant 0 : i32
    %c0_i32_0 = arith.constant 0 : i32
    return %arg0, %c0_i32 : i32, i32
  }
  func.func @transform_1(%arg0: i32) -> (i32, i32) {
    %c0_i32 = arith.constant 0 : i32
    %c0_i32_0 = arith.constant 0 : i32
    return %arg0, %c0_i32 : i32, i32
  }
  func.func @transform_2(%arg0: i32) -> (i32, i32) {
    %c0_i32 = arith.constant 0 : i32
    %c0_i32_0 = arith.constant 0 : i32
    return %arg0, %c0_i32 : i32, i32
  }
}

</mosaic_0001>

<bundles_post_ra>
// kernel: tpu_custom_call.1
= control target key start
LH: loop header
LB: loop body
LE: loop exit
PB: predicated region body
PF: predicated region fallthrough
CT: control target
= control target key end

     0   :  { %7 = vsyncpa [#allocation3], 0  ;;  %s166_s0 = inlined_call_operand.hbm [shape: f32[8,32], index: 0, kind: input, shape index: {}]   ;;  %s167_s1 = inlined_call_operand.hbm [shape: f32[8,32], index: 1, kind: input, shape index: {}]   ;;  %s168_s2 = inlined_call_operand.vmem [shape: f32[8,1], index: 2, kind: output, shape index: {}]  }
   0x1   :  { %8 = vsyncpa [#allocation5], 0  ;;  %s122_s9 = smov [#allocation2]   ;;  %s123_s11 = smov [#allocation4]  }
   0x2   :  { %s15_s10 = sshll.u32 %s122_s9, 4  ;;  %s25_s12 = sshll.u32 %s123_s11, 4  ;;  %s16_s10 = int_to_ptr.vmem [resolvable:$true] %s15_s10  ;;  %s26_s12 = int_to_ptr.vmem [resolvable:$true] %s25_s12 }
   0x3   :  { %s74_s15 = scalar_lea.hbm %s166_s0, 128 }
   0x4   :  { %p75_p0 = scmp.ne.s32.totalorder %s166_s0, %s74_s15  ;;  %p78_p1 = scmp.lt.u32.totalorder %s74_s15, %s166_s0 }
   0x6   :  { %p80_p2 = pnand %p78_p1, %p75_p0 }
   0x8   :  { %83 = shalt.err (!%p80_p2)
}
   0x9   :  { %s84_s20 = scalar_lea.vmem %s16_s10, 128  ;;  %p89_p4 = scmp.lt.s32.totalorder %s16_s10, %s16_s10 }
   0xa   :  { %p85_p3 = scmp.ne.s32.totalorder %s16_s10, %s84_s20  ;;  %p90_p5 = scmp.lt.s32.totalorder %s84_s20, %s84_s20 }
   0xc   :  { %p91_p6 = por %p90_p5, %p89_p4 }
   0xe   :  { %p92_p7 = pnand %p91_p6, %p85_p3 }
  0x10   :  { %95 = shalt.err (!%p92_p7)
}
  0x11   :  { %18 = dma.hbm_to_vmem [thread:$0]  %s166_s0, 128, %s16_s10, [#allocation3]  }
  0x12   :  { %s96_s25 = scalar_lea.hbm %s167_s1, 128 }
  0x13   :  { %p97_p8 = scmp.ne.s32.totalorder %s167_s1, %s96_s25  ;;  %p100_p9 = scmp.lt.u32.totalorder %s96_s25, %s167_s1 }
  0x15   :  { %p102_p10 = pnand %p100_p9, %p97_p8 }
  0x17   :  { %105 = shalt.err (!%p102_p10)
}
  0x18   :  { %s106_s30 = scalar_lea.vmem %s26_s12, 128  ;;  %p111_p12 = scmp.lt.s32.totalorder %s26_s12, %s26_s12 }
  0x19   :  { %p107_p11 = scmp.ne.s32.totalorder %s26_s12, %s106_s30  ;;  %p112_p13 = scmp.lt.s32.totalorder %s106_s30, %s106_s30 }
  0x1b   :  { %p113_p0 = por %p112_p13, %p111_p12 }
  0x1d   :  { %p114_p1 = pnand %p113_p0, %p107_p11 }
  0x1f   :  { %117 = shalt.err (!%p114_p1)
}
  0x20   :  { %28 = dma.hbm_to_vmem [thread:$0]  %s167_s1, 128, %s26_s12, [#allocation5]  }
  0x21   :  { %118 = dma.done.wait [#allocation3], 128  }
  0x22   :  { %119 = vsyncadd [#allocation3], 4294967168 }
  0x23   :  { %120 = dma.done.wait [#allocation5], 128  }
  0x24   :  { %121 = vsyncadd [#allocation5], 4294967168  ;;  %v35_v0 = vld [vmem:[#allocation2] sm:$0xff]  ;;  %v36_v1 = vld [vmem:[#allocation4] sm:$0xff]  ;;  %vm42_vm0 = vcmask 261120   ;;  %vm60_vm2 = vcmask 7168  }
  0x25   :  { %v38_v2 = vadd.f32 %v36_v1, %v35_v0  ;;  %v37_v3 = vsub.f32 %v35_v0, %v36_v1 }
  0x27   :  { %70 = vrcp.f32 %v38_v2 }
  0x31   :  { %v71_v4 = vpop.eup %70 }
  0x32   :  { %v40_v5 = vmul.f32 %v71_v4, %v37_v3 }
  0x34   :  { %v41_v6 = vmul.f32 %v40_v5, %v40_v5 }
  0x36   :  { %v43_v7 = vsel %vm42_vm0, %v41_v6, 0.0 }
  0x37   :  { %44 = vadd.xlane.f32.xlu0 %v43_v7 }
  0xc4   :  { %v45_v8 = vpop.xlane.xlu0 %44 }
  0xc5   :  { %72 = vrsqrt.f32 %v45_v8  ;;  %vm48_vm1 = vcmp.eq.f32.partialorder %v45_v8, inf  ;;  %v51_v11 = vand.u32 2147483648, %v45_v8  ;;  %vm50_vm3 = vcmp.eq.f32.partialorder %v45_v8, 0.0 }
  0xcf   :  { %v73_v9 = vpop.eup %72 }
  0xd0   :  { %v47_v10 = vmul.f32 %v73_v9, %v45_v8 }
  0xd2   :  { %v49_v12 = vsel %vm48_vm1, %v45_v8, %v47_v10 }
  0xd3   :  { %v52_v13 = vsel %vm50_vm3, %v51_v11, %v49_v12 }
  0xd4   :  { %61 = vst.msk [vmem:[%s168_s2] sm:$0xff] %vm60_vm2, %v52_v13 }
  0xd5   :  { %66 = vsyncpa [#allocation3], 1 }
  0xd6   :  { %67 = vsyncpa [#allocation5], 1 }

</bundles_post_ra>
